<compile_context>
chip_gen: v5e
topology: v5e:2x2
jax: 0.10.0
libtpu: 0.0.40
codegen_flags: <defaults>
</compile_context>

<pallas_src>
import functools

import jax
import jax.numpy as jnp
from jax.experimental import pallas as pl
from jax.experimental.pallas import tpu as pltpu


def _generator_kernel(z_ref, c_ref, w1z_ref, w1c_ref, b1_ref, w3_ref, b3_ref,
                      x_ref, hid_ref):
    # fc1 on the (implicitly) concatenated input: [z, c] @ W1.T + b1
    h = jnp.dot(z_ref[...], w1z_ref[...], preferred_element_type=jnp.float32)
    h = h + jnp.dot(c_ref[...], w1c_ref[...], preferred_element_type=jnp.float32)
    h = h + b1_ref[...]                      # f32 bias, broadcast over the tile
    # LeakyReLU(0.2): single vmax
    h = jnp.maximum(h, 0.2 * h)
    hid_ref[...] = h.astype(hid_ref.dtype)   # self.out
    # fc3 + sigmoid (f32 accumulate, f32 sigmoid)
    x2 = jnp.dot(h.astype(w3_ref.dtype), w3_ref[...],
                 preferred_element_type=jnp.float32)
    x2 = x2 + b3_ref[...]
    x_ref[...] = jax.nn.sigmoid(x2).astype(x_ref.dtype)


def prepare_generator_params(w1, b1, w3, b3, latent_size,
                             compute_dtype=jnp.bfloat16):
    """One-time parameter re-layout (keep OUT of the per-step hot path).

    w1: (h0, 2*latent)  b1: (h0,)   (PyTorch Linear layout)
    w3: (h1, h0)        b3: (h1,)
    Returns (w1z (latent,h0), w1c (latent,h0), b1 (1,h0) f32,
             w3t (h0,h1),     b3 (1,h1) f32), matmul operands in compute_dtype.
    """
    h0 = w1.shape[0]
    h1 = w3.shape[0]
    w1z = jnp.asarray(w1[:, :latent_size].T, dtype=compute_dtype)   # (latent, h0)
    w1c = jnp.asarray(w1[:, latent_size:].T, dtype=compute_dtype)   # (latent, h0)
    w3t = jnp.asarray(w3.T, dtype=compute_dtype)                    # (h0, h1)
    b1_2d = jnp.asarray(b1, dtype=jnp.float32).reshape(1, h0)
    b3_2d = jnp.asarray(b3, dtype=jnp.float32).reshape(1, h1)
    return w1z, w1c, b1_2d, w3t, b3_2d


def generator_forward(z, c, params, *, tile_b=256, out_dtype=None):
    """z: (B, latent), c: (B, latent); params from prepare_generator_params.
    Returns (x (B, h1), hidden (B, h0))  -- hidden is the module's self.out."""
    w1z, w1c, b1, w3t, b3 = params
    B, latent = z.shape
    h0 = w1z.shape[1]
    h1 = w3t.shape[1]
    compute_dtype = w1z.dtype
    if out_dtype is None:
        out_dtype = z.dtype

    # Matmul operands in the MXU-native dtype (accumulation stays f32 in-kernel).
    zc = z.astype(compute_dtype)
    cc = c.astype(compute_dtype)

    # Batch tile: multiple of 8 (f32/bf16 sublane granularity); pad B up so the
    # grid divides evenly, slice the padding off afterwards.
    tb = min(tile_b, B)
    tb = max(8, ((tb + 7) // 8) * 8)
    Bp = pl.cdiv(B, tb) * tb
    if Bp != B:
        pad = Bp - B
        zc = jnp.pad(zc, ((0, pad), (0, 0)))
        cc = jnp.pad(cc, ((0, pad), (0, 0)))

    grid = (Bp // tb,)

    x, hidden = pl.pallas_call(
        _generator_kernel,
        out_shape=(jax.ShapeDtypeStruct((Bp, h1), out_dtype),
                   jax.ShapeDtypeStruct((Bp, h0), out_dtype)),
        grid=grid,
        in_specs=[
            # activations: tiled over batch, double-buffered by Pallas
            pl.BlockSpec((tb, latent), lambda i: (i, 0)),
            pl.BlockSpec((tb, latent), lambda i: (i, 0)),
            # weights / biases: constant block index -> VMEM resident
            pl.BlockSpec((latent, h0), lambda i: (0, 0)),
            pl.BlockSpec((latent, h0), lambda i: (0, 0)),
            pl.BlockSpec((1, h0), lambda i: (0, 0)),
            pl.BlockSpec((h0, h1), lambda i: (0, 0)),
            pl.BlockSpec((1, h1), lambda i: (0, 0)),
        ],
        out_specs=(pl.BlockSpec((tb, h1), lambda i: (i, 0)),
                   pl.BlockSpec((tb, h0), lambda i: (i, 0))),
        compiler_params=pltpu.CompilerParams(
            # batch tiles are independent -> shard across v7x's 2 TensorCores
            dimension_semantics=("parallel",),
            # explicit budget; re-derive tile_b if weights + 2x activation tiles
            # approach this (v7x physical VMEM is 64 MiB).
            vmem_limit_bytes=64 * 1024 * 1024,
        ),
    )(zc, cc, w1z, w1c, b1, w3t, b3)

    if Bp != B:
        x = x[:B]
        hidden = hidden[:B]
    return x, hidden


if __name__ == "__main__":
    # Small, deterministic problem sizes consistent with the module:
    #   latent_size=16 -> fc1 input = 32, layer_sizes = [32, 48], batch = 8.
    B, LATENT, H0, H1 = 8, 16, 32, 48

    key = jax.random.PRNGKey(0)
    k_z, k_c, k_w1, k_w3 = jax.random.split(key, 4)

    z = jax.random.normal(k_z, (B, LATENT), dtype=jnp.float32)
    c = jax.random.normal(k_c, (B, LATENT), dtype=jnp.float32)

    # weights_init: Linear.weight ~ N(0, 0.02), bias = 0
    w1 = 0.02 * jax.random.normal(k_w1, (H0, 2 * LATENT), dtype=jnp.float32)
    b1 = jnp.zeros((H0,), dtype=jnp.float32)
    w3 = 0.02 * jax.random.normal(k_w3, (H1, H0), dtype=jnp.float32)
    b3 = jnp.zeros((H1,), dtype=jnp.float32)

    # One-time parameter re-layout (outside the hot path), bf16 matmul operands.
    params = prepare_generator_params(w1, b1, w3, b3, LATENT,
                                      compute_dtype=jnp.bfloat16)

    fwd = jax.jit(functools.partial(generator_forward, tile_b=256))
    x, hidden = fwd(z, c, params)
    jax.block_until_ready((x, hidden))

    # Pure-JAX f32 reference (same semantics as the PyTorch forward).
    h_ref = jnp.concatenate([z, c], axis=-1) @ w1.T + b1
    h_ref = jnp.where(h_ref > 0, h_ref, 0.2 * h_ref)          # LeakyReLU(0.2)
    x_ref = jax.nn.sigmoid(h_ref @ w3.T + b3)                  # Sigmoid(fc3)

    # bf16 matmul operands + f32 accumulation -> loose-ish tolerance.
    assert jnp.allclose(x, x_ref, atol=1e-2), "output (x) mismatch"
    assert jnp.allclose(hidden, h_ref, atol=1e-2), "hidden (self.out) mismatch"

    print("KERNEL_OK")
</pallas_src>

<mosaic_0001>
module attributes {stable_mosaic.version = 11 : i64} {
  func.func @_generator_kernel(%arg0: i32, %arg1: memref<8x16xbf16, #tpu.memory_space<vmem>>, %arg2: memref<8x16xbf16, #tpu.memory_space<vmem>>, %arg3: memref<16x32xbf16, #tpu.memory_space<vmem>>, %arg4: memref<16x32xbf16, #tpu.memory_space<vmem>>, %arg5: memref<1x32xf32, #tpu.memory_space<vmem>>, %arg6: memref<32x48xbf16, #tpu.memory_space<vmem>>, %arg7: memref<1x48xf32, #tpu.memory_space<vmem>>, %arg8: memref<8x48xf32, #tpu.memory_space<vmem>>, %arg9: memref<8x32xf32, #tpu.memory_space<vmem>>) attributes {dimension_semantics = [#tpu.dimension_semantics<parallel>], iteration_bounds = array<i64: 1>, scalar_prefetch = 0 : i64, scratch_operands = 0 : i64, tpu.core_type = #tpu.core_type<tc>, window_params = [{transform_indices = @transform_0, window_bounds = array<i64: 8, 16>}, {transform_indices = @transform_1, window_bounds = array<i64: 8, 16>}, {pipeline_mode = #tpu.pipeline_mode<synchronous>, transform_indices = @transform_2, window_bounds = array<i64: 16, 32>}, {pipeline_mode = #tpu.pipeline_mode<synchronous>, transform_indices = @transform_3, window_bounds = array<i64: 16, 32>}, {pipeline_mode = #tpu.pipeline_mode<synchronous>, transform_indices = @transform_4, window_bounds = array<i64: 1, 32>}, {pipeline_mode = #tpu.pipeline_mode<synchronous>, transform_indices = @transform_5, window_bounds = array<i64: 32, 48>}, {pipeline_mode = #tpu.pipeline_mode<synchronous>, transform_indices = @transform_6, window_bounds = array<i64: 1, 48>}, {transform_indices = @transform_7, window_bounds = array<i64: 8, 48>}, {transform_indices = @transform_8, window_bounds = array<i64: 8, 32>}]} {
    %c0 = arith.constant 0 : index
    %c0_0 = arith.constant 0 : index
    %0 = vector.load %arg1[%c0, %c0_0] : memref<8x16xbf16, #tpu.memory_space<vmem>>, vector<8x16xbf16>
    %c0_1 = arith.constant 0 : index
    %c0_2 = arith.constant 0 : index
    %1 = vector.load %arg3[%c0_1, %c0_2] : memref<16x32xbf16, #tpu.memory_space<vmem>>, vector<16x32xbf16>
    %cst = arith.constant dense<0.000000e+00> : vector<8x32xf32>
    %2 = tpu.matmul %0, %1, %cst {dimension_numbers = #tpu.dot_dimension_numbers<[1], [0], [0], [1], [0, 0, 1, 1], [], []>} : vector<8x16xbf16>, vector<16x32xbf16>, vector<8x32xf32> -> vector<8x32xf32>
    %c0_3 = arith.constant 0 : index
    %c0_4 = arith.constant 0 : index
    %3 = vector.load %arg2[%c0_3, %c0_4] : memref<8x16xbf16, #tpu.memory_space<vmem>>, vector<8x16xbf16>
    %c0_5 = arith.constant 0 : index
    %c0_6 = arith.constant 0 : index
    %4 = vector.load %arg4[%c0_5, %c0_6] : memref<16x32xbf16, #tpu.memory_space<vmem>>, vector<16x32xbf16>
    %cst_7 = arith.constant dense<0.000000e+00> : vector<8x32xf32>
    %5 = tpu.matmul %3, %4, %cst_7 {dimension_numbers = #tpu.dot_dimension_numbers<[1], [0], [0], [1], [0, 0, 1, 1], [], []>} : vector<8x16xbf16>, vector<16x32xbf16>, vector<8x32xf32> -> vector<8x32xf32>
    %6 = arith.addf %2, %5 : vector<8x32xf32>
    %c0_8 = arith.constant 0 : index
    %c0_9 = arith.constant 0 : index
    %7 = vector.load %arg5[%c0_8, %c0_9] : memref<1x32xf32, #tpu.memory_space<vmem>>, vector<1x32xf32>
    %8 = vector.broadcast %7 : vector<1x32xf32> to vector<8x32xf32>
    %9 = arith.addf %6, %8 : vector<8x32xf32>
    %cst_10 = arith.constant 2.000000e-01 : f32
    %10 = vector.broadcast %cst_10 : f32 to vector<8x32xf32>
    %11 = arith.mulf %10, %9 : vector<8x32xf32>
    %12 = arith.maximumf %9, %11 : vector<8x32xf32>
    %c0_11 = arith.constant 0 : index
    %c0_12 = arith.constant 0 : index
    %13 = vector.load %arg9[%c0_11, %c0_12] : memref<8x32xf32, #tpu.memory_space<vmem>>, vector<8x32xf32>
    tpu.vector_store %arg9[%c0_11, %c0_12], %12 {strides = array<i32>} : memref<8x32xf32, #tpu.memory_space<vmem>>, vector<8x32xf32>,
    %14 = arith.truncf %12 : vector<8x32xf32> to vector<8x32xbf16>
    %c0_13 = arith.constant 0 : index
    %c0_14 = arith.constant 0 : index
    %15 = vector.load %arg6[%c0_13, %c0_14] : memref<32x48xbf16, #tpu.memory_space<vmem>>, vector<32x48xbf16>
    %cst_15 = arith.constant dense<0.000000e+00> : vector<8x48xf32>
    %16 = tpu.matmul %14, %15, %cst_15 {dimension_numbers = #tpu.dot_dimension_numbers<[1], [0], [0], [1], [0, 0, 1, 1], [], []>} : vector<8x32xbf16>, vector<32x48xbf16>, vector<8x48xf32> -> vector<8x48xf32>
    %c0_16 = arith.constant 0 : index
    %c0_17 = arith.constant 0 : index
    %17 = vector.load %arg7[%c0_16, %c0_17] : memref<1x48xf32, #tpu.memory_space<vmem>>, vector<1x48xf32>
    %18 = vector.broadcast %17 : vector<1x48xf32> to vector<8x48xf32>
    %19 = arith.addf %16, %18 : vector<8x48xf32>
    %20 = arith.negf %19 : vector<8x48xf32>
    %21 = math.exp %20 : vector<8x48xf32>
    %cst_18 = arith.constant 1.000000e+00 : f32
    %22 = vector.broadcast %cst_18 : f32 to vector<8x48xf32>
    %23 = arith.addf %22, %21 : vector<8x48xf32>
    %24 = arith.divf %22, %23 : vector<8x48xf32>
    %c0_19 = arith.constant 0 : index
    %c0_20 = arith.constant 0 : index
    %25 = vector.load %arg8[%c0_19, %c0_20] : memref<8x48xf32, #tpu.memory_space<vmem>>, vector<8x48xf32>
    tpu.vector_store %arg8[%c0_19, %c0_20], %24 {strides = array<i32>} : memref<8x48xf32, #tpu.memory_space<vmem>>, vector<8x48xf32>,
    return
  }
  func.func @transform_0(%arg0: i32) -> (i32, i32) {
    %c0_i32 = arith.constant 0 : i32
    %c0_i32_0 = arith.constant 0 : i32
    return %arg0, %c0_i32 : i32, i32
  }
  func.func @transform_1(%arg0: i32) -> (i32, i32) {
    %c0_i32 = arith.constant 0 : i32
    %c0_i32_0 = arith.constant 0 : i32
    return %arg0, %c0_i32 : i32, i32
  }
  func.func @transform_2(%arg0: i32) -> (i32, i32) {
    %c0_i32 = arith.constant 0 : i32
    %c0_i32_0 = arith.constant 0 : i32
    %c0_i32_1 = arith.constant 0 : i32
    return %c0_i32, %c0_i32_0 : i32, i32
  }
  func.func @transform_3(%arg0: i32) -> (i32, i32) {
    %c0_i32 = arith.constant 0 : i32
    %c0_i32_0 = arith.constant 0 : i32
    %c0_i32_1 = arith.constant 0 : i32
    return %c0_i32, %c0_i32_0 : i32, i32
  }
  func.func @transform_4(%arg0: i32) -> (i32, i32) {
    %c0_i32 = arith.constant 0 : i32
    %c0_i32_0 = arith.constant 0 : i32
    %c0_i32_1 = arith.constant 0 : i32
    return %c0_i32, %c0_i32_0 : i32, i32
  }
  func.func @transform_5(%arg0: i32) -> (i32, i32) {
    %c0_i32 = arith.constant 0 : i32
    %c0_i32_0 = arith.constant 0 : i32
    %c0_i32_1 = arith.constant 0 : i32
    return %c0_i32, %c0_i32_0 : i32, i32
  }
  func.func @transform_6(%arg0: i32) -> (i32, i32) {
    %c0_i32 = arith.constant 0 : i32
    %c0_i32_0 = arith.constant 0 : i32
    %c0_i32_1 = arith.constant 0 : i32
    return %c0_i32, %c0_i32_0 : i32, i32
  }
  func.func @transform_7(%arg0: i32) -> (i32, i32) {
    %c0_i32 = arith.constant 0 : i32
    %c0_i32_0 = arith.constant 0 : i32
    return %arg0, %c0_i32 : i32, i32
  }
  func.func @transform_8(%arg0: i32) -> (i32, i32) {
    %c0_i32 = arith.constant 0 : i32
    %c0_i32_0 = arith.constant 0 : i32
    return %arg0, %c0_i32 : i32, i32
  }
}

</mosaic_0001>

<bundles_post_ra>
// kernel: generator_forward.1
= control target key start
LH: loop header
LB: loop body
LE: loop exit
PB: predicated region body
PF: predicated region fallthrough
CT: control target
= control target key end

     0   :  { %14 = vsyncpa [#allocation3], 0  ;;  %s436_s0 = inlined_call_operand.vmem [shape: bf16[8,16], index: 0, kind: input, shape index: {}]   ;;  %s437_s1 = inlined_call_operand.vmem [shape: bf16[8,16], index: 1, kind: input, shape index: {}]   ;;  %s438_s2 = inlined_call_operand.hbm [shape: bf16[16,32], index: 2, kind: input, shape index: {}]   ;;  %s439_s3 = inlined_call_operand.hbm [shape: bf16[16,32], index: 3, kind: input, shape index: {}]   ;;  %s440_s4 = inlined_call_operand.vmem [shape: f32[1,32], index: 4, kind: input, shape index: {}]   ;;  %s441_s5 = inlined_call_operand.vmem [shape: bf16[32,48], index: 5, kind: input, shape index: {}]   ;;  %s442_s6 = inlined_call_operand.vmem [shape: f32[1,48], index: 6, kind: input, shape index: {}]   ;;  %s443_s7 = inlined_call_operand.hbm [shape: f32[8,48], index: 7, kind: output, shape index: {0}]   ;;  %s444_s8 = inlined_call_operand.hbm [shape: f32[8,32], index: 8, kind: output, shape index: {1}]  }
   0x1   :  { %15 = vsyncpa [#allocation6], 0 }
   0x2   :  { %16 = vsyncpa [#allocation4], 0 }
   0x3   :  { %17 = vsyncpa [#allocation9], 0  ;;  %s26_s29 = sshll.u32 %s438_s2, 4  ;;  %s355_s30 = smov [#allocation2]   ;;  %s27_s29 = int_to_ptr.hbm [resolvable:$true] %s26_s29 }
   0x4   :  { %s28_s9 = sshll.u32 %s355_s30, 4  ;;  %s39_s12 = sshll.u32 %s439_s3, 4  ;;  %s29_s9 = int_to_ptr.vmem [resolvable:$true] %s28_s9  ;;  %s40_s12 = int_to_ptr.hbm [resolvable:$true] %s39_s12 }
   0x5   :  { %s356_s13 = smov 64   ;;  %s357_s14 = smov 4  }
   0x6   :  { %34 = dma.hbm_to_vmem [thread:$0]  %s27_s29, 128, %s29_s9, [#allocation3], %s356_s13, %s356_s13, %s357_s14  }
   0x7   :  { %s358_s15 = smov [#allocation5]  }
   0x8   :  { %s41_s16 = sshll.u32 %s358_s15, 4  ;;  %s42_s16 = int_to_ptr.vmem [resolvable:$true] %s41_s16 }
   0x9   :  { %47 = dma.hbm_to_vmem [thread:$0]  %s40_s12, 128, %s42_s16, [#allocation6], %s356_s13, %s356_s13, %s357_s14  }
   0xa   :  { %347 = dma.done.wait [#allocation3], 128  }
   0xb   :  { %348 = vsyncadd [#allocation3], 4294967168 }
   0xc   :  { %349 = dma.done.wait [#allocation6], 128  }
   0xd   :  { %350 = vsyncadd [#allocation6], 4294967168  ;;  %v236_v0 = vld [vmem:[#allocation5] sm:$0xff]  ;;  %v235_v1 = vld [vmem:[#allocation2] sm:$0xff]  ;;  %vm75_vm0 = vcmask 130048   ;;  %vm121_vm1 = vcmask 261120  }
   0xe   :  { %86 = vmatpush.bf16.msra.mxu0 %v236_v0  ;;  %108 = vmatpush.bf16.msra.mxu1 %v235_v1  ;;  %v66_v2 = vld [vmem:[%s437_s1] sm:$0xf]  ;;  %v238_v4 = vld [vmem:[%s441_s5 + $0x8] sm:$0xff]  ;;  %s199_s26 = sshll.u32 %s444_s8, 4  ;;  %s360_s8 = smov [#allocation7]   ;;  %vm179_vm5 = vcmask 392192   ;;  %s200_s26 = int_to_ptr.hbm [resolvable:$true] %s199_s26 }
   0xf   :  { %v63_v3 = vld [vmem:[%s436_s0] sm:$0xf]  ;;  %153 = vmatpush.bf16.msra.mxu2 %v238_v4  ;;  %s359_s0 = smov [#allocation8]   ;;  %s186_s28 = sshll.u32 %s360_s8, 4  ;;  %s187_s28 = int_to_ptr.vmem [resolvable:$true] %s186_s28 }
  0x10   :  { %v237_v5 = vld [vmem:[%s441_s5] sm:$0xff]  ;;  %s197_s1 = sshll.u32 %s359_s0, 4  ;;  %s198_s1 = int_to_ptr.vmem [resolvable:$true] %s197_s1 }
  0x11   :  { %219 = vmatmul.msk.bf16.vlgmr.msra.gmra.mxu0 %vm75_vm0, %v66_v2  ;;  %224 = vmatmul.msk.bf16.vlgmr.msra.gmra.mxu1 %vm75_vm0, %v63_v3  ;;  %v245_v6 = vld [vmem:[%s440_s4] ss:$0 sm:$0xff] }
  0x12   :  { %v246_v16 = vld [vmem:[%s442_s6] ss:$0 sm:$0xff]  ;;  %s188_s6 = sshll.u32 %s443_s7, 4  ;;  %s189_s6 = int_to_ptr.hbm [resolvable:$true] %s188_s6 }
  0x13   :  { %154 = vmatpush.bf16.msra.mxu2 %v237_v5 }
  0x8e   :  { %v88_v7 = vpop.f32.mrf.mxu0  ;;  %v110_v8 = vpop.f32.mrf.mxu1 }
  0x8f   :  { %v111_v9 = vadd.f32 %v110_v8, %v88_v7 }
  0x91   :  { %v118_v10 = vadd.f32 %v245_v6, %v111_v9 }
  0x93   :  { %v119_v11 = vmul.f32 0.2, %v118_v10 }
  0x95   :  { %v120_v12 = vmax.f32 %v118_v10, %v119_v11 }
  0x96   :  { %v90_v13 = vpop.f32.mrf.mxu0  ;;  %v112_v14 = vpop.f32.mrf.mxu1 }
  0x97   :  { %v123_v15 = vpack.c.bf16 %v120_v12, %v120_v12  ;;  %122 = vst.msk [vmem:[#allocation8] sm:$0xff] %vm121_vm1, %v120_v12 }
  0x98   :  { %202 = dma.vmem_to_hbm [thread:$0]  %s198_s1, 128, %s200_s26, [#allocation9]  }
  0x99   :  { %233 = vmatmul.msk.bf16.vlgmr.msra.gmra.mxu2 %vm121_vm1, %v123_v15 }
 0x11c   :  { %v156_v17 = vpop.f32.mrf.mxu2 }
 0x11d   :  { %v157_v18 = vadd.f32 %v246_v16, %v156_v17 }
 0x11f   :  { %v234_v19 = vmul.f32 -1.442695, %v157_v18 }
 0x121   :  { %247 = vpow2.f32 %v234_v19 }
 0x124   :  { %v158_v20 = vpop.f32.mrf.mxu2 }
 0x127   :  { %v248_v21 = vpop.eup %247 }
 0x128   :  { %v163_v22 = vadd.f32 1.0, %v248_v21 }
 0x12a   :  { %249 = vrcp.f32 %v163_v22  ;;  %v175_v26 = vand.u32 2147483648, %v163_v22  ;;  %v173_v28 = vand.u32 2147483647, %v163_v22  ;;  %vm169_vm3 = vweird.f32 %v163_v22 }
 0x12c   :  { %v176_v30 = vor.u32 1.1754944e-38, %v175_v26  ;;  %vm174_vm6 = vcmp.eq.f32.partialorder %v173_v28, 8.507059e+37 }
 0x130   :  { %v250_v23 = vpop.eup %249 }
 0x131   :  { %v165_v24 = vmul.f32 %v250_v23, %v163_v22  ;;  %vm170_vm2 = vweird.f32 %v250_v23 }
 0x132   :  { %vm171_vm4 = vmor %vm169_vm3, %vm170_vm2 }
 0x133   :  { %v166_v25 = vsub.f32 1.0, %v165_v24 }
 0x135   :  { %v167_v27 = vmul.f32 %v250_v23, %v166_v25 }
 0x137   :  { %v168_v29 = vadd.f32 %v250_v23, %v167_v27 }
 0x139   :  { %v172_v31 = vsel %vm171_vm4, %v250_v23, %v168_v29 }
 0x13a   :  { %v177_v32 = vsel %vm174_vm6, %v176_v30, %v172_v31 }
 0x13b   :  { %180 = vst.msk [vmem:[#allocation7] sm:$0xff] %vm179_vm5, %v177_v32 }
 0x13c   :  { %191 = dma.vmem_to_hbm [thread:$0]  %s187_s28, 128, %s189_s6, [#allocation4]  }
 0x13d   :  { %351 = dma.done.wait [#allocation4], 128  }
 0x13e   :  { %352 = vsyncadd [#allocation4], 4294967168 }
 0x13f   :  { %353 = dma.done.wait [#allocation9], 128  }
 0x140   :  { %354 = vsyncadd [#allocation9], 4294967168 }
 0x141   :  { %211 = vsyncpa [#allocation3], 1 }
 0x142   :  { %212 = vsyncpa [#allocation6], 1 }
 0x143   :  { %213 = vsyncpa [#allocation4], 1 }
 0x144   :  { %214 = vsyncpa [#allocation9], 1 }

</bundles_post_ra>
